<compile_context>
chip_gen: v6e
topology: v6e:2x2x1
jax: 0.10.0
libtpu: 0.0.40
codegen_flags: <defaults>
</compile_context>

<pallas_src>
import functools
import math

import jax
import jax.numpy as jnp
from jax.experimental import pallas as pl
from jax.experimental.pallas import tpu as pltpu


def _round_up(a: int, b: int) -> int:
    return (a + b - 1) // b * b


def _vmem_budget_bytes() -> int:
    """~75% of physical VMEM (v5e/v6e: 128 MiB, v7x: 64 MiB); conservative fallback."""
    try:
        phys = int(pltpu.get_tpu_info().vmem_capacity_bytes)
    except Exception:
        phys = 64 * 1024 * 1024
    return max(32 * 1024 * 1024, int(0.75 * phys))


def _decoder_block_kernel(x_ref, s_ref, w1_ref, w2_ref, b_ref, o_ref, *,
                          compute_dtype, approx_sigmoid):
    """scores = x@W1 + s@W2 + (b1+b2); out = s * sigmoid(scores)."""
    s_full = s_ref[...]                                          # caller dtype (full precision)
    scores = (
        jnp.dot(x_ref[...].astype(compute_dtype), w1_ref[...],
                preferred_element_type=jnp.float32)
        + jnp.dot(s_full.astype(compute_dtype), w2_ref[...],
                  preferred_element_type=jnp.float32)
        + b_ref[...].astype(jnp.float32)                         # pre-folded b1 + b2
    )
    if approx_sigmoid:
        # exp (EUP) + approximate reciprocal (EUP): keeps the epilogue off the VALU
        # slot -- useful on v5e if profiling shows the sigmoid chain binding.
        weights = pl.reciprocal(1.0 + jnp.exp(-scores), approx=True)
    else:
        weights = jax.nn.sigmoid(scores)
    # TODO(synk): training-mode dropout (p=0.1) omitted; nn.Dropout is identity at eval.
    o_ref[...] = (s_full.astype(jnp.float32) * weights).astype(o_ref.dtype)


def decoder_block(x, sent_repr, w1_t, b1, w2_t, b2, *, tile_m=1024,
                  compute_dtype=jnp.bfloat16, out_dtype=None,
                  approx_sigmoid=False):
    """x, sent_repr: [B, T, D]; w*_t: [D, D] already transposed to (in, out); b*: [D].

    compute_dtype: dtype fed to the MXU (bf16 recommended; f32 for bit-for-bit
    parity with an f32 reference).  Accumulation / sigmoid / product are f32.
    out_dtype:     storage dtype of the result (default: x.dtype).
    """
    B, T, D = x.shape
    M = B * T
    out_dtype = jnp.dtype(x.dtype if out_dtype is None else out_dtype)
    compute_dtype = jnp.dtype(compute_dtype)

    # x / sent_repr are streamed in their native dtype (cast happens in-kernel).
    x2 = x.reshape(M, D)
    s2 = sent_repr.reshape(M, D)
    # Weights are tiny and resident: one-time host cast to the MXU dtype is fine.
    w1c = w1_t.astype(compute_dtype)
    w2c = w2_t.astype(compute_dtype)
    # Fold the two biases on the host: one fewer DMA stream + one fewer VPU add.
    b12 = (b1.astype(jnp.float32) + b2.astype(jnp.float32)).reshape(1, D)

    # Row tile: sublane-aligned, >= 2 grid steps so both v7x TensorCores get work.
    tm = min(_round_up(tile_m, 8), max(8, _round_up(pl.cdiv(M, 2), 8)))

    d_lane = _round_up(D, 128)   # VMEM layouts are (8,128)-tiled internally
    xb = jnp.dtype(x.dtype).itemsize
    sb = jnp.dtype(sent_repr.dtype).itemsize
    ob = out_dtype.itemsize
    cb = compute_dtype.itemsize

    def vmem_bytes(rows):
        return (2 * rows * d_lane * (xb + sb + ob)   # x, s, out: double-buffered streams
                + 2 * d_lane * d_lane * cb           # W1^T, W2^T: single-buffered, resident
                + 8 * d_lane * 4)                    # folded bias (sublane-padded)

    cap = _vmem_budget_bytes()
    while tm > 8 and vmem_bytes(tm) > cap:
        tm = max(8, _round_up(tm // 2, 8))
    # TODO(synk): for very large d_model (bf16 D >= ~2048 on v7x) resident weights
    # alone exceed VMEM; that case needs a second grid axis over weight output
    # columns (stream W, keep the row blocks resident).
    vmem_limit = min(cap, max(32 * 1024 * 1024, int(1.25 * vmem_bytes(tm))))

    grid = (pl.cdiv(M, tm),)          # ragged last block handled by Pallas masking
    row = lambda i: (i, 0)
    const = lambda i: (0, 0)

    out = pl.pallas_call(
        functools.partial(_decoder_block_kernel,
                          compute_dtype=compute_dtype,
                          approx_sigmoid=approx_sigmoid),
        out_shape=jax.ShapeDtypeStruct((M, D), out_dtype),
        grid_spec=pltpu.PrefetchScalarGridSpec(
            num_scalar_prefetch=0,
            grid=grid,
            in_specs=[
                pl.BlockSpec((tm, D), row),   # x rows (caller dtype)
                pl.BlockSpec((tm, D), row),   # sent_repr rows (caller dtype)
                pl.BlockSpec((D, D), const, pipeline_mode=pl.Buffered(1)),   # W1^T, fetched once
                pl.BlockSpec((D, D), const, pipeline_mode=pl.Buffered(1)),   # W2^T, fetched once
                pl.BlockSpec((1, D), const, pipeline_mode=pl.Buffered(1)),   # b1 + b2, fetched once
            ],
            out_specs=pl.BlockSpec((tm, D), row),
        ),
        compiler_params=pltpu.CompilerParams(
            dimension_semantics=("parallel",),
            vmem_limit_bytes=vmem_limit,
        ),
    )(x2, s2, w1c, w2c, b12)

    return out.reshape(B, T, D)


def decoder_block_cat(x, sent_repr, w_t, b, **kwargs):
    """mode='cat_attn': scores = cat([x, s], -1) @ W^T + b.

    w_t is W^T of shape (2*D, D).  cat([x, s]) @ W^T == x @ W^T[:D] + s @ W^T[D:],
    so the same fused kernel serves both modes.
    """
    D = x.shape[-1]
    zeros = jnp.zeros_like(b)
    return decoder_block(x, sent_repr, w_t[:D], b, w_t[D:], zeros, **kwargs)


def init_linear_params(key, d_in, d_out):
    """Deterministic init mimicking torch.nn.Linear (uniform +-1/sqrt(d_in))."""
    k_w, k_b = jax.random.split(key)
    bound = 1.0 / math.sqrt(d_in)
    w = jax.random.uniform(k_w, (d_out, d_in), jnp.float32, -bound, bound)
    b = jax.random.uniform(k_b, (d_out,), jnp.float32, -bound, bound)
    return w, b


def reference_decoder_block(x, sent_repr, w1, b1, w2, b2):
    """Pure-JAX reference of the PyTorch forward (add_attn, eval mode), f32."""
    scores = x @ w1.T + b1 + sent_repr @ w2.T + b2
    return sent_repr * jax.nn.sigmoid(scores)


def reference_decoder_block_cat(x, sent_repr, w, b):
    """Pure-JAX reference of the PyTorch forward (cat_attn, eval mode), f32."""
    scores = jnp.concatenate([x, sent_repr], axis=-1) @ w.T + b
    return sent_repr * jax.nn.sigmoid(scores)


if __name__ == "__main__":
    D = 32  # d_model
    key = jax.random.PRNGKey(0)
    k_x, k_s, k_w1, k_w2, k_w = jax.random.split(key, 5)

    # nn.Linear weights in PyTorch layout (out, in)
    w1, b1 = init_linear_params(k_w1, D, D)
    w2, b2 = init_linear_params(k_w2, D, D)

    # ---- add_attn, even row count (B=2, T=8) -------------------------------
    B, T = 2, 8
    x = jax.random.normal(k_x, (B, T, D), jnp.float32)
    s = jax.random.normal(k_s, (B, T, D), jnp.float32)
    ref = reference_decoder_block(x, s, w1, b1, w2, b2)

    out_f32 = jax.block_until_ready(
        decoder_block(x, s, w1.T, b1, w2.T, b2, compute_dtype=jnp.float32))
    assert out_f32.shape == (B, T, D)
    assert jnp.allclose(out_f32, ref, atol=1e-4, rtol=1e-4), "f32 path mismatch"

    out_bf16 = jax.block_until_ready(
        decoder_block(x, s, w1.T, b1, w2.T, b2, compute_dtype=jnp.bfloat16))
    assert jnp.allclose(out_bf16, ref, atol=3e-2, rtol=3e-2), \
        "bf16 path too far from f32 reference"

    out_apx = jax.block_until_ready(
        decoder_block(x, s, w1.T, b1, w2.T, b2, compute_dtype=jnp.float32,
                      approx_sigmoid=True))
    assert jnp.allclose(out_apx, ref, atol=2e-2, rtol=2e-2), \
        "approx-sigmoid path mismatch"

    # ---- ragged row count (M = 15 is not a multiple of the row tile) -------
    Br, Tr = 3, 5
    xr = jax.random.normal(k_x, (Br, Tr, D), jnp.float32)
    sr = jax.random.normal(k_s, (Br, Tr, D), jnp.float32)
    ref_r = reference_decoder_block(xr, sr, w1, b1, w2, b2)
    out_r = jax.block_until_ready(
        decoder_block(xr, sr, w1.T, b1, w2.T, b2, compute_dtype=jnp.float32))
    assert jnp.allclose(out_r, ref_r, atol=1e-4, rtol=1e-4), "ragged-M mismatch"

    # ---- cat_attn -----------------------------------------------------------
    w, b = init_linear_params(k_w, 2 * D, D)
    ref_c = reference_decoder_block_cat(x, s, w, b)
    out_c = jax.block_until_ready(
        decoder_block_cat(x, s, w.T, b, compute_dtype=jnp.float32))
    assert jnp.allclose(out_c, ref_c, atol=1e-4, rtol=1e-4), "cat_attn mismatch"

    print("KERNEL_OK")
</pallas_src>

<mosaic_0001>
module attributes {stable_mosaic.version = 11 : i64} {
  func.func @_decoder_block_kernel(%arg0: i32, %arg1: memref<8x32xf32, #tpu.memory_space<vmem>>, %arg2: memref<8x32xf32, #tpu.memory_space<vmem>>, %arg3: memref<32x32xf32, #tpu.memory_space<vmem>>, %arg4: memref<32x32xf32, #tpu.memory_space<vmem>>, %arg5: memref<1x32xf32, #tpu.memory_space<vmem>>, %arg6: memref<8x32xf32, #tpu.memory_space<vmem>>) attributes {dimension_semantics = [#tpu.dimension_semantics<parallel>], iteration_bounds = array<i64: 2>, scalar_prefetch = 0 : i64, scratch_operands = 0 : i64, tpu.core_type = #tpu.core_type<tc>, window_params = [{transform_indices = @transform_0, window_bounds = array<i64: 8, 32>}, {transform_indices = @transform_1, window_bounds = array<i64: 8, 32>}, {pipeline_mode = #tpu.pipeline_mode<synchronous>, transform_indices = @transform_2, window_bounds = array<i64: 32, 32>}, {pipeline_mode = #tpu.pipeline_mode<synchronous>, transform_indices = @transform_3, window_bounds = array<i64: 32, 32>}, {pipeline_mode = #tpu.pipeline_mode<synchronous>, transform_indices = @transform_4, window_bounds = array<i64: 1, 32>}, {transform_indices = @transform_5, window_bounds = array<i64: 8, 32>}]} {
    %c0 = arith.constant 0 : index
    %c0_0 = arith.constant 0 : index
    %0 = vector.load %arg2[%c0, %c0_0] : memref<8x32xf32, #tpu.memory_space<vmem>>, vector<8x32xf32>
    %c0_1 = arith.constant 0 : index
    %c0_2 = arith.constant 0 : index
    %1 = vector.load %arg1[%c0_1, %c0_2] : memref<8x32xf32, #tpu.memory_space<vmem>>, vector<8x32xf32>
    %c0_3 = arith.constant 0 : index
    %c0_4 = arith.constant 0 : index
    %2 = vector.load %arg3[%c0_3, %c0_4] : memref<32x32xf32, #tpu.memory_space<vmem>>, vector<32x32xf32>
    %cst = arith.constant dense<0.000000e+00> : vector<8x32xf32>
    %3 = tpu.matmul %1, %2, %cst {dimension_numbers = #tpu.dot_dimension_numbers<[1], [0], [0], [1], [0, 0, 1, 1], [], []>} : vector<8x32xf32>, vector<32x32xf32>, vector<8x32xf32> -> vector<8x32xf32>
    %c0_5 = arith.constant 0 : index
    %c0_6 = arith.constant 0 : index
    %4 = vector.load %arg4[%c0_5, %c0_6] : memref<32x32xf32, #tpu.memory_space<vmem>>, vector<32x32xf32>
    %cst_7 = arith.constant dense<0.000000e+00> : vector<8x32xf32>
    %5 = tpu.matmul %0, %4, %cst_7 {dimension_numbers = #tpu.dot_dimension_numbers<[1], [0], [0], [1], [0, 0, 1, 1], [], []>} : vector<8x32xf32>, vector<32x32xf32>, vector<8x32xf32> -> vector<8x32xf32>
    %6 = arith.addf %3, %5 : vector<8x32xf32>
    %c0_8 = arith.constant 0 : index
    %c0_9 = arith.constant 0 : index
    %7 = vector.load %arg5[%c0_8, %c0_9] : memref<1x32xf32, #tpu.memory_space<vmem>>, vector<1x32xf32>
    %8 = vector.broadcast %7 : vector<1x32xf32> to vector<8x32xf32>
    %9 = arith.addf %6, %8 : vector<8x32xf32>
    %10 = arith.negf %9 : vector<8x32xf32>
    %11 = math.exp %10 : vector<8x32xf32>
    %cst_10 = arith.constant 1.000000e+00 : f32
    %12 = vector.broadcast %cst_10 : f32 to vector<8x32xf32>
    %13 = arith.addf %12, %11 : vector<8x32xf32>
    %14 = arith.divf %12, %13 : vector<8x32xf32>
    %15 = arith.mulf %0, %14 : vector<8x32xf32>
    %c0_11 = arith.constant 0 : index
    %c0_12 = arith.constant 0 : index
    %16 = vector.load %arg6[%c0_11, %c0_12] : memref<8x32xf32, #tpu.memory_space<vmem>>, vector<8x32xf32>
    tpu.vector_store %arg6[%c0_11, %c0_12], %15 {strides = array<i32>} : memref<8x32xf32, #tpu.memory_space<vmem>>, vector<8x32xf32>,
    return
  }
  func.func @transform_0(%arg0: i32) -> (i32, i32) {
    %c0_i32 = arith.constant 0 : i32
    %c0_i32_0 = arith.constant 0 : i32
    return %arg0, %c0_i32 : i32, i32
  }
  func.func @transform_1(%arg0: i32) -> (i32, i32) {
    %c0_i32 = arith.constant 0 : i32
    %c0_i32_0 = arith.constant 0 : i32
    return %arg0, %c0_i32 : i32, i32
  }
  func.func @transform_2(%arg0: i32) -> (i32, i32) {
    %c0_i32 = arith.constant 0 : i32
    %c0_i32_0 = arith.constant 0 : i32
    %c0_i32_1 = arith.constant 0 : i32
    return %c0_i32, %c0_i32_0 : i32, i32
  }
  func.func @transform_3(%arg0: i32) -> (i32, i32) {
    %c0_i32 = arith.constant 0 : i32
    %c0_i32_0 = arith.constant 0 : i32
    %c0_i32_1 = arith.constant 0 : i32
    return %c0_i32, %c0_i32_0 : i32, i32
  }
  func.func @transform_4(%arg0: i32) -> (i32, i32) {
    %c0_i32 = arith.constant 0 : i32
    %c0_i32_0 = arith.constant 0 : i32
    %c0_i32_1 = arith.constant 0 : i32
    return %c0_i32, %c0_i32_0 : i32, i32
  }
  func.func @transform_5(%arg0: i32) -> (i32, i32) {
    %c0_i32 = arith.constant 0 : i32
    %c0_i32_0 = arith.constant 0 : i32
    return %arg0, %c0_i32 : i32, i32
  }
}

</mosaic_0001>

<bundles_post_ra>
// kernel: tpu_custom_call.1
= control target key start
LH: loop header
LB: loop body
LE: loop exit
PB: predicated region body
PF: predicated region fallthrough
CT: control target
= control target key end

     0   :  { %s1196_s0 = inlined_call_operand.hbm [shape: f32[16,32], index: 0, kind: input, shape index: {}]   ;;  %s1197_s1 = inlined_call_operand.hbm [shape: f32[16,32], index: 1, kind: input, shape index: {}]   ;;  %s1198_s2 = inlined_call_operand.hbm [shape: f32[32,32], index: 2, kind: input, shape index: {}]   ;;  %s1199_s3 = inlined_call_operand.hbm [shape: f32[32,32], index: 3, kind: input, shape index: {}]   ;;  %s1200_s4 = inlined_call_operand.vmem [shape: f32[1,32], index: 4, kind: input, shape index: {}]   ;;  %s1201_s5 = inlined_call_operand.hbm [shape: f32[16,32], index: 5, kind: output, shape index: {}]  }
   0x1   :  { %1206 = sst [smem:[#allocation16_spill]] %s1198_s2 }
   0x2   :  { %1207 = sst [smem:[#allocation17_spill]] %s1199_s3 }
   0x3   :  { %10 = vsyncpa [#allocation3], 0 }
   0x4   :  { %12 = vsyncpa [#allocation3 + $0x1], 0 }
   0x5   :  { %13 = vsyncpa [#allocation6], 0 }
   0x6   :  { %15 = vsyncpa [#allocation6 + $0x1], 0 }
   0x7   :  { %16 = vsyncpa [#allocation9], 0 }
   0x8   :  { %17 = vsyncpa [#allocation4], 0 }
   0x9   :  { %19 = vsyncpa [#allocation4 + $0x1], 0  ;;  %s965_s18 = smov 0   ;;  %s967_s19 = smov 0  }
   0xa   :  { %s969_s20 = smov 0   ;;  %s971_s21 = smov 0  }
   0xb LB: > { %s986_s22 = sadd.s32 4294967295, %s924_s21   ;;  %s605_s23 = sadd.s32 4294967294, %s924_s21   ;;  %s924_s21 = sphi %s971_s21, %s1229_s21   ;;  %s920_s20 = sphi %s969_s20, %s1228_s20   ;;  %s916_s19 = sphi %s967_s19, %s1227_s19   ;;  %s912_s18 = sphi %s965_s18, %s1226_s18  }
   0xc   : > { %p45_p0 = scmp.ne.s32.totalorder %s916_s19, %s912_s18  ;;  %p1202_p1 = scmp.eq.s32.totalorder %s986_s22, 0 }
   0xd   : > { %p164_p3 = scmp.eq.s32.totalorder %s605_s23, 1  ;;  %p606_p5 = scmp.ge.s32.totalorder %s924_s21, 1 }
   0xe   : > { %p995_p4 = por %p1202_p1, %p45_p0  ;;  %p171_p7 = scmp.lt.s32.totalorder %s924_s21, 3 }
   0xf   : > { %p1000_p6 = por %p164_p3, %p45_p0  ;;  %s926_s27 = smov [#allocation7]  }
  0x10   : > { %s1208_s24 = scalar_select %p995_p4, 1, 0 }
  0x11   : > { %s1209_s25 = scalar_select %p1000_p6, 1, 0 }
  0x12   : > { %p1005_p8 = pnand %p606_p5, %p171_p7  ;;  %s183_s28 = sshll.u32 %s926_s27, 4  ;;  %s184_s28 = int_to_ptr.vmem [resolvable:$true] %s183_s28 }
  0x13   : > { %s927_s30 = smov [#allocation8]   ;;  %s751_s7 = scalar_lea.vmem %s184_s28, 512 }
  0x14   : > { %s1210_s26 = scalar_select %p1005_p8, 1, 0 }
  0x15   : > { %p674_p9 = pneg %p1005_p8  ;;  %s196_s6 = sshll.u32 %s927_s30, 4  ;;  %s197_s6 = int_to_ptr.vmem [resolvable:$true] %s196_s6 }
  0x16   : > { %p752_p13 = scmp.ne.s32.totalorder %s184_s28, %s751_s7  ;;  %p759_p5 = scmp.lt.s32.totalorder %s184_s28, %s184_s28 }
  0x17   : > { %p1014_p11 = pnand %p674_p9, %p1202_p1  ;;  %p760_p7 = scmp.lt.s32.totalorder %s751_s7, %s751_s7 }
  0x19   : > { %p742_p12 = pneg %p1014_p11  ;;  %p761_p10 = por %p760_p7, %p759_p5 }
  0x1b   : > { %p754_p0 = pnand %p752_p13, %p742_p12 }
  0x1d   : > { %p755_p3 = pneg %p754_p0 }
  0x1f   : > { %p762_p9 = pnand %p761_p10, %p755_p3 }
  0x21   : > { %765 = shalt.err (!%p762_p9)
}
  0x22   : > { %s928_s8 = smov 128   ;;  %s929_s9 = smov 8  }
  0x23   : > { %s1212_s2 = sld [smem:[#allocation16_spill]]  ;;  %s777_s12 = scalar_lea.vmem %s197_s6, 512 }
  0x24   : > { %p778_p1 = scmp.ne.s32.totalorder %s197_s6, %s777_s12  ;;  %p785_p2 = scmp.lt.s32.totalorder %s197_s6, %s197_s6 }
  0x25   : > { %p786_p6 = scmp.lt.s32.totalorder %s777_s12, %s777_s12 }
  0x26   : > { %p780_p13 = pnand %p778_p1, %p742_p12 }
  0x27   : > { %p787_p5 = por %p786_p6, %p785_p2 }
  0x28   : > { %p781_p0 = pneg %p780_p13 }
  0x29   : > { %677 = dma.hbm_to_vmem [thread:$0]  (!%p1014_p11), %s1212_s2, 512, %s184_s28, [#allocation6], %s928_s8, %s928_s8, %s929_s9  }
  0x2a   : > { %p788_p10 = pnand %p787_p5, %p781_p0 }
  0x2c   : > { %791 = shalt.err (!%p788_p10)
}
  0x2d   : > { %s1213_s3 = sld [smem:[#allocation17_spill]]  ;;  %s1037_s15 = sadd.s32 1, %s924_s21  }
  0x2e   : > { %s32_s16 = sadd.s32 1, %s920_s20  ;;  %s29_s17 = ssub.s32 %s924_s21, %s1037_s15 }
  0x2f   : > { %p39_p1 = scmp.ne.s32.totalorder %s920_s20, %s916_s19  ;;  %p30_p2 = scmp.eq.s32.totalorder %s29_s17, 0 }
  0x30   : > { %p40_p6 = scmp.eq.s32.totalorder %s924_s21, 0  ;;  %p1214_p12 = scmp.eq.s32.totalorder %s986_s22, 1 }
  0x31   : > { %p694_p7 = scmp.lt.s32.totalorder %s924_s21, 2  ;;  %s213_s28 = sand.u32 1, %s920_s20  }
  0x32   : > { %p1047_p3 = por %p1214_p12, %p39_p1  ;;  %p41_p9 = por %p40_p6, %p39_p1 }
  0x33   : > { %680 = dma.hbm_to_vmem [thread:$0]  (!%p1014_p11), %s1213_s3, 512, %s197_s6, [#allocation9], %s928_s8, %s928_s8, %s929_s9  }
  0x34   : > { %s1215_s23 = scalar_select %p1047_p3, 1, 0 }
  0x35   : > { %s1053_s27 = scalar_select %p30_p2, %s920_s20, %s32_s16  }
  0x36   : > { %s1056_s29 = sshll.u32 %s213_s28, 3  ;;  %s611_s30 = sshll.u32 %s924_s21, 7 }
  0x37   : > { %s1062_s8 = scalar_lea.hbm %s1196_s0, %s611_s30  ;;  %s217_s9 = scalar_lea.vmem [#allocation2], %s1056_s29 }
  0x38   : > { %s224_s10 = sshll.u32 %s217_s9, 4  ;;  %p1067_p11 = pnand %p694_p7, %p41_p9  ;;  %s1065_s10 = int_to_ptr.vmem [resolvable:$true] %s224_s10 }
  0x39   : > { %s1074_s14 = scalar_lea.hbm %s1197_s1, %s611_s30  ;;  %s231_s16 = sand.u32 1, %s924_s21  }
  0x3a   : > { %s214_s17 = scalar_lea.sflag [#allocation3], %s213_s28  ;;  %s792_s6 = scalar_lea.hbm %s1062_s8, 128 }
  0x3b   : > { %p793_p13 = scmp.ne.s32.totalorder %s1062_s8, %s792_s6  ;;  %p794_p0 = pneg %p1067_p11 }
  0x3c   : > { %s797_s2 = scalar_lea.hbm %s1196_s0, 256  ;;  %p798_p1 = scmp.lt.s32.totalorder %s1062_s8, %s1196_s0 }
  0x3d   : > { %p795_p5 = pnand %p794_p0, %p793_p13  ;;  %p799_p2 = scmp.lt.s32.totalorder %s797_s2, %s792_s6 }
  0x3f   : > { %p796_p10 = pneg %p795_p5  ;;  %p800_p6 = por %p799_p2, %p798_p1 }
  0x41   : > { %p801_p12 = pnand %p800_p6, %p796_p10 }
  0x43   : > { %804 = shalt.err (!%p801_p12)
}
  0x44   : > { %s805_s28 = scalar_lea.vmem %s1065_s10, 128  ;;  %s930_s30 = smov [#allocation2]  }
  0x45   : > { %p806_p7 = scmp.ne.s32.totalorder %s1065_s10, %s805_s28  ;;  %s810_s13 = sshll.u32 %s930_s30, 4  ;;  %s811_s13 = int_to_ptr.vmem [resolvable:$false] %s810_s13 }
  0x46   : > { %s812_s7 = scalar_lea.vmem %s811_s13, 256  ;;  %p813_p5 = scmp.lt.s32.totalorder %s1065_s10, %s811_s13 }
  0x47   : > { %p808_p9 = pnand %p806_p7, %p794_p0  ;;  %p814_p3 = scmp.lt.s32.totalorder %s812_s7, %s805_s28 }
  0x49   : > { %p809_p13 = pneg %p808_p9  ;;  %p815_p4 = por %p814_p3, %p813_p5 }
  0x4b   : > { %p816_p1 = pnand %p815_p4, %p809_p13 }
  0x4d   : > { %819 = shalt.err (!%p816_p1)
}
  0x4e   : > { %684 = dma.hbm_to_vmem [thread:$0]  (!%p1067_p11), %s1062_s8, 128, %s1065_s10, %s214_s17  }
  0x4f   : > { %s235_s2 = scalar_lea.vmem [#allocation5], %s1056_s29  ;;  %s232_s6 = scalar_lea.sflag [#allocation6], %s231_s16 }
  0x50   : > { %s242_s3 = sshll.u32 %s235_s2, 4  ;;  %s820_s9 = scalar_lea.hbm %s1074_s14, 128  ;;  %s243_s3 = int_to_ptr.vmem [resolvable:$true] %s242_s3 }
  0x51   : > { %p821_p3 = scmp.ne.s32.totalorder %s1074_s14, %s820_s9  ;;  %s825_s30 = scalar_lea.hbm %s1197_s1, 256 }
  0x52   : > { %p826_p2 = scmp.lt.s32.totalorder %s1074_s14, %s1197_s1  ;;  %p827_p6 = scmp.lt.s32.totalorder %s825_s30, %s820_s9 }
  0x53   : > { %p823_p4 = pnand %p821_p3, %p794_p0 }
  0x54   : > { %p828_p12 = por %p827_p6, %p826_p2 }
  0x55   : > { %p824_p10 = pneg %p823_p4 }
  0x57   : > { %p829_p7 = pnand %p828_p12, %p824_p10 }
  0x59   : > { %832 = shalt.err (!%p829_p7)
}
  0x5a   : > { %s833_s29 = scalar_lea.vmem %s243_s3, 128  ;;  %s931_s8 = smov [#allocation5]  }
  0x5b   : > { %p834_p9 = scmp.ne.s32.totalorder %s243_s3, %s833_s29  ;;  %s838_s10 = sshll.u32 %s931_s8, 4  ;;  %s839_s10 = int_to_ptr.vmem [resolvable:$false] %s838_s10 }
  0x5c   : > { %s840_s16 = scalar_lea.vmem %s839_s10, 256  ;;  %p841_p1 = scmp.lt.s32.totalorder %s243_s3, %s839_s10 }
  0x5d   : > { %p836_p13 = pnand %p834_p9, %p794_p0  ;;  %p842_p3 = scmp.lt.s32.totalorder %s840_s16, %s833_s29 }
  0x5f   : > { %p837_p5 = pneg %p836_p13  ;;  %p843_p4 = por %p842_p3, %p841_p1 }
  0x61   : > { %p844_p8 = pnand %p843_p4, %p837_p5 }
  0x63   : > { %847 = shalt.err (!%p844_p8)
}
  0x64   : > { %687 = dma.hbm_to_vmem [thread:$0]  (!%p1067_p11), %s1074_s14, 128, %s243_s3, %s232_s6  }
  0x65   : > { %p1217_p10 = scmp.ne.s32.totalorder %s1210_s26, 0 }
  0x66   : > { %s1125_s17 = sand.u32 (!%p1217_p10), 1, %s916_s19   ;;  %p1218_p0 = scmp.ne.s32.totalorder (!%p1217_p10), %s1208_s24, 0 }
  0x67   : > { %251 = sbr.rel (%p1217_p10) target bundleno = 372 (0x174), region = 40  ;;  %s1128_s2 = sshll.u32 (!%p1217_p10), %s1125_s17, 3 }
  0x68   : > { %s254_s9 = scalar_lea.sflag (!%p1217_p10), [#allocation3], %s1125_s17  ;;  %s257_s12 = scalar_lea.vmem (!%p1217_p10), [#allocation2], %s1128_s2 }
  0x6c   : > { %891 = dma.done.wait (%p1218_p0), %s254_s9, 128  }
  0x6d   : > { %893 = vsyncadd (%p1218_p0), %s254_s9, 4294967168  ;;  %s262_s26 = sand.u32 1, %s986_s22   ;;  %s266_s14 = scalar_lea.vmem [#allocation5], %s1128_s2 }
  0x6e   : > { %s263_s11 = scalar_lea.sflag [#allocation6], %s262_s26 }
  0x6f   : > { %895 = dma.done.wait (%p1218_p0), %s263_s11, 128  }
  0x70   : > { %897 = vsyncadd (%p1218_p0), %s263_s11, 4294967168  ;;  %p1219_p8 = scmp.eq.s32.totalorder %s986_s22, 0 }
  0x72   : > { %899 = dma.done.wait (%p1219_p8), [#allocation6], 512   ;;  %p1220_p11 = pmov %p1219_p8 }
  0x73   : > { %p1221_p2 = pmov %p1219_p8 }
  0x74   : > { %901 = vsyncadd (%p1220_p11), [#allocation6], 4294966784 }
  0x75   : > { %903 = dma.done.wait (%p1221_p2), [#allocation9], 512   ;;  %p1222_p6 = pmov %p1221_p2 }
  0x76   : > { %v932_v0 = vmov 0.0   ;;  %vm933_vm0 = vmmov 0   ;;  %v315_v1 = vld [vmem:[#allocation8 + $0x18] sm:$0xff]  ;;  %v314_v3 = vld [vmem:[#allocation8 + $0x10] sm:$0xff]  ;;  %v313_v5 = vld [vmem:[#allocation8 + $0x8] sm:$0xff]  ;;  %vm316_vm1 = vcmask 261120  }
  0x77   : > { %905 = vsyncadd (%p1222_p6), [#allocation9], 4294966784  ;;  %638 = vmatprep.subr.mxu0 %v932_v0  ;;  %649 = vmatprep.subr.mxu1 %v932_v0  ;;  %v311_v2 = vld [vmem:[#allocation7 + $0x18] sm:$0xff]  ;;  %v310_v4 = vld [vmem:[#allocation7 + $0x10] sm:$0xff]  ;;  %s625_s6 = sshll.u32 %s986_s22, 7  ;;  %s305_s28 = scalar_lea.vmem [#allocation10], %s1128_s2 }
  0x78   : > { %646 = vmatprep.mubr.msk.f32.mxu0 %vm933_vm0, %v932_v0  ;;  %657 = vmatprep.mubr.msk.f32.mxu1 %vm933_vm0, %v932_v0  ;;  %v309_v6 = vld [vmem:[#allocation7 + $0x8] sm:$0xff]  ;;  %v312_v7 = vld [vmem:[#allocation8] sm:$0xff]  ;;  %v306_v9 = vld [vmem:[%s266_s14] sm:$0xff]  ;;  %s493_s30 = sshll.u32 %s305_s28, 4  ;;  %s491_s29 = scalar_lea.hbm %s1201_s5, %s625_s6  ;;  %s494_s30 = int_to_ptr.vmem [resolvable:$true] %s493_s30 }
  0x79   : > { %639 = vmatpush3.msra.mxu0 %v315_v1  ;;  %650 = vmatpush3.msra.mxu1 %v311_v2  ;;  %v308_v8 = vld [vmem:[#allocation7] sm:$0xff]  ;;  %s480_s8 = scalar_lea.sflag [#allocation4], %s1125_s17  ;;  %s848_s10 = scalar_lea.vmem %s494_s30, 128 }
  0x7a   : > { %640 = vmatprep.subr.mxu0 %v932_v0  ;;  %651 = vmatprep.subr.mxu1 %v932_v0  ;;  %v307_v10 = vld [vmem:[%s257_s12] sm:$0xff]  ;;  %p849_p12 = scmp.ne.s32.totalorder %s494_s30, %s848_s10  ;;  %p1223_p7 = scmp.ne.s32.totalorder %s1215_s23, 0 }
  0x7b   : > { %641 = vmatpush3.msra.mxu0 %v314_v3  ;;  %652 = vmatpush3.msra.mxu1 %v310_v4  ;;  %v622_v13 = vld [vmem:[%s1200_s4] ss:$0 sm:$0xff]  ;;  %s934_s16 = smov [#allocation10]  }
  0x7c   : > { %642 = vmatprep.subr.mxu0 %v932_v0  ;;  %653 = vmatprep.subr.mxu1 %v932_v0  ;;  %p850_p9 = pnand %p849_p12, %p1223_p7  ;;  %s852_s9 = sshll.u32 %s934_s16, 4  ;;  %s853_s9 = int_to_ptr.vmem [resolvable:$false] %s852_s9 }
  0x7d   : > { %643 = vmatpush3.msra.mxu0 %v313_v5  ;;  %654 = vmatpush3.msra.mxu1 %v309_v6  ;;  %s854_s22 = scalar_lea.vmem %s853_s9, 256  ;;  %p855_p5 = scmp.lt.s32.totalorder %s494_s30, %s853_s9 }
  0x7e   : > { %644 = vmatprep.subr.mxu0 %v932_v0  ;;  %655 = vmatprep.subr.mxu1 %v932_v0  ;;  %p851_p13 = pneg %p850_p9  ;;  %p856_p1 = scmp.lt.s32.totalorder %s854_s22, %s848_s10 }
  0x7f   : > { %645 = vmatpush3.msra.mxu0 %v312_v7  ;;  %656 = vmatpush3.msra.mxu1 %v308_v8 }
  0x80   : > { %647 = vmatmul.mubr.msk.f32.vlgmr.msra.gmra.mxu0 %vm316_vm1, %v306_v9  ;;  %658 = vmatmul.mubr.msk.f32.vlgmr.msra.gmra.mxu1 %vm316_vm1, %v307_v10  ;;  %p857_p3 = por %p856_p1, %p855_p5 }
  0x82   : > { %p858_p4 = pnand %p857_p3, %p851_p13 }
 0x140   : > { %v386_v11 = vpop.f32.mrf.mxu0  ;;  %v459_v12 = vpop.f32.mrf.mxu1 }
 0x141   : > { %v460_v14 = vadd.f32 %v459_v12, %v386_v11 }
 0x142   : > { %v648_v15 = vpop.f32.mrf.mxu0  ;;  %v659_v16 = vpop.f32.mrf.mxu1 }
 0x143   : > { %v470_v17 = vadd.f32 %v622_v13, %v460_v14 }
 0x145   : > { %v623_v18 = vmul.f32 -1.442695, %v470_v17 }
 0x147   : > { %736 = vpow2.f32 %v623_v18 }
 0x154   : > { %v737_v19 = vpop.eup %736 }
 0x155   : > { %v474_v20 = vadd.f32 1.0, %v737_v19 }
 0x157   : > { %738 = vrcp.f32 %v474_v20 }
 0x164   : > { %v739_v21 = vpop.eup %738 }
 0x165   : > { %v477_v22 = vmul.f32 %v739_v21, %v306_v9 }
 0x167   : > { %478 = vst.msk [vmem:[%s305_s28] sm:$0xff] %vm316_vm1, %v477_v22 }
 0x168   : > { %861 = shalt.err (!%p858_p4)
}
 0x169   : > { %s862_s2 = scalar_lea.hbm %s491_s29, 128  ;;  %s866_s26 = scalar_lea.hbm %s1201_s5, 256 }
 0x16a   : > { %p863_p10 = scmp.ne.s32.totalorder %s491_s29, %s862_s2  ;;  %p867_p11 = scmp.lt.s32.totalorder %s491_s29, %s1201_s5 }
 0x16b   : > { %p868_p2 = scmp.lt.s32.totalorder %s866_s26, %s862_s2 }
 0x16c   : > { %p864_p0 = pnand %p863_p10, %p1223_p7 }
 0x16d   : > { %p869_p6 = por %p868_p2, %p867_p11 }
 0x16e   : > { %p865_p8 = pneg %p864_p0 }
 0x170   : > { %p870_p12 = pnand %p869_p6, %p865_p8 }
 0x172   : > { %873 = shalt.err (!%p870_p12)
}
 0x173   : > { %672 = dma.vmem_to_hbm [thread:$0]  (%p1223_p7), %s494_s30, 128, %s491_s29, %s480_s8  }
 0x174 PF: > { %s505_s24 = sand.u32 1, %s912_s18   ;;  %p1224_p9 = scmp.ne.s32.totalorder %s1209_s25, 0 }
 0x175   : > { %p1225_p13 = scmp.ge.s32.totalorder %s924_s21, 2  ;;  %s506_s3 = scalar_lea.sflag [#allocation4], %s505_s24 }
 0x177   : > { %p689_p5 = pnand %p1225_p13, %p1224_p9 }
 0x179   : > { %p690_p1 = pneg %p689_p5 }
 0x17b   : > { %907 = dma.done.wait (%p690_p1), %s506_s3, 128  }
 0x17c   : > { %909 = vsyncadd (%p690_p1), %s506_s3, 4294967168  ;;  %p22_p3 = scmp.ge.s32.totalorder %s1037_s15, 4   ;;  %s1226_s18 = smov %s916_s19 }
 0x17d   : > { %s1227_s19 = smov %s920_s20  ;;  %s1228_s20 = smov %s1053_s27 }
 0x17e   : > { %s1229_s21 = smov %s1037_s15  ;;  %24 = sbr.rel (!%p22_p3) target bundleno = 11 (0xb), region = 106 }
 0x183   :  { %511 = vsyncpa [#allocation3], 1 }
 0x184   :  { %513 = vsyncpa [#allocation3 + $0x1], 1 }
 0x185   :  { %514 = vsyncpa [#allocation6], 1 }
 0x186   :  { %516 = vsyncpa [#allocation6 + $0x1], 1 }
 0x187   :  { %517 = vsyncpa [#allocation9], 1 }
 0x188   :  { %518 = vsyncpa [#allocation4], 1 }
 0x189   :  { %520 = vsyncpa [#allocation4 + $0x1], 1 }

</bundles_post_ra>
